<compile_context>
chip_gen: v6e
topology: v6e:2x2x1
jax: 0.10.0
libtpu: 0.0.40
codegen_flags: <defaults>
</compile_context>

<pallas_src>
import math
import functools

import jax
import jax.numpy as jnp
from jax.experimental import pallas as pl
from jax.experimental.pallas import tpu as pltpu


# ------------------------------- kernels ----------------------------------- #

def _pe_add_kernel(x_ref, pe_ref, o_ref):
    """Eval path: o = x + pe (pe broadcast over the batch/sublane axis)."""
    o_ref[...] = (x_ref[...] + pe_ref[...]).astype(o_ref.dtype)


def _pe_add_dropout_kernel(x_ref, pe_ref, bits_ref, o_ref, *, threshold, scale):
    """Train path: o = inverted_dropout(x + pe).

    bits_ref holds uniform uint32 random bits; an element is dropped iff
    bits < threshold (threshold = round(p * 2^32)), i.e. with probability p.
    Kept elements are scaled by 1/(1-p). Pure VALU compare/select — no float
    conversion chain, so the dropout path stays hidden under the DMA.
    """
    y = x_ref[...] + pe_ref[...]
    keep = bits_ref[...] >= jnp.uint32(threshold)
    o_ref[...] = jnp.where(keep, y * scale, jnp.zeros_like(y)).astype(o_ref.dtype)


# ------------------------------- wrapper ------------------------------------ #

def make_pos_embedding(emb_size: int, maxlen: int = 5000, dtype=jnp.float32):
    """Deterministic buffer, identical math to the PyTorch __init__."""
    den = jnp.exp(
        -jnp.arange(0, emb_size, 2, dtype=jnp.float32) * math.log(10000.0) / emb_size
    )
    pos = jnp.arange(0, maxlen, dtype=jnp.float32).reshape(maxlen, 1)
    pe = jnp.zeros((maxlen, emb_size), dtype=jnp.float32)
    pe = pe.at[:, 0::2].set(jnp.sin(pos * den))
    pe = pe.at[:, 1::2].set(jnp.cos(pos * den))
    return pe[:, None, :].astype(dtype)  # (maxlen, 1, emb_size)


def _pick_block_seq(S, B, E, itemsize, target_bytes=1 << 20):
    """~1 MiB (ts, B, E) blocks: big enough to amortize the ~0.35 us/step grid
    overhead, small enough that double-buffered in+out+bits blocks fit the
    scoped VMEM default on every chip (v5e 16 MiB, v6e 32 MiB, v7x 32 MiB)."""
    row_bytes = max(1, B * E * itemsize)
    ts = max(1, target_bytes // row_bytes)
    return int(min(S, ts))


def positional_encoding(
    token_embedding,
    pos_embedding,
    *,
    dropout_p: float = 0.1,
    training: bool = False,
    rng_key=None,
    block_seq: int | None = None,
):
    S, B, E = token_embedding.shape
    dtype = token_embedding.dtype
    itemsize = jnp.dtype(dtype).itemsize

    # Glue slice + cast, same as pos_embedding[:token_embedding.size(0)].
    pe = pos_embedding[:S].astype(dtype)  # (S, 1, E)

    ts = int(block_seq) if block_seq else _pick_block_seq(S, B, E, itemsize)
    grid = (pl.cdiv(S, ts),)

    # TODO(synk): for small B (<8) or E not a multiple of 128, the (B, E) ->
    # (sublane, lane) mapping under-fills vregs and triggers masked partial
    # stores; a lane-dense 2-D (S*B, E) view would be faster but requires the
    # caller to materialize pe replicated over batch.
    x_spec = pl.BlockSpec((ts, B, E), lambda i: (i, 0, 0))
    pe_spec = pl.BlockSpec((ts, 1, E), lambda i: (i, 0, 0))
    out_spec = pl.BlockSpec((ts, B, E), lambda i: (i, 0, 0))

    # Grid steps are fully independent -> allow megacore sharding on v7x.
    cparams = pltpu.CompilerParams(dimension_semantics=("parallel",))

    use_dropout = bool(training) and float(dropout_p) > 0.0

    if not use_dropout:
        cost = pl.CostEstimate(
            flops=S * B * E,
            transcendentals=0,
            bytes_accessed=(2 * S * B * E + S * E) * itemsize,
        )
        return pl.pallas_call(
            _pe_add_kernel,
            out_shape=jax.ShapeDtypeStruct((S, B, E), dtype),
            grid_spec=pltpu.PrefetchScalarGridSpec(
                num_scalar_prefetch=0,
                grid=grid,
                in_specs=[x_spec, pe_spec],
                out_specs=out_spec,
            ),
            compiler_params=cparams,
            cost_estimate=cost,
            input_output_aliases={0: 0},  # reuse token_embedding's HBM buffer
        )(token_embedding, pe)

    # Training path: inverted dropout with an integer-threshold compare.
    # TODO(synk): torch's exact dropout RNG stream is not reproducible; only the
    # distributional semantics (keep prob 1-p, scale 1/(1-p)) are matched.
    p = float(dropout_p)
    threshold = min(int(round(p * 2.0 ** 32)), 2 ** 32 - 1)
    scale = 1.0 / (1.0 - p)
    if rng_key is None:
        rng_key = jax.random.PRNGKey(0)
    bits = jax.random.bits(rng_key, (S, B, E), dtype=jnp.uint32)

    cost = pl.CostEstimate(
        flops=3 * S * B * E,
        transcendentals=0,
        bytes_accessed=(2 * S * B * E + S * E) * itemsize + 4 * S * B * E,
    )
    kernel = functools.partial(
        _pe_add_dropout_kernel, threshold=threshold, scale=scale
    )
    bits_spec = pl.BlockSpec((ts, B, E), lambda i: (i, 0, 0))

    return pl.pallas_call(
        kernel,
        out_shape=jax.ShapeDtypeStruct((S, B, E), dtype),
        grid_spec=pltpu.PrefetchScalarGridSpec(
            num_scalar_prefetch=0,
            grid=grid,
            in_specs=[x_spec, pe_spec, bits_spec],
            out_specs=out_spec,
        ),
        compiler_params=cparams,
        cost_estimate=cost,
        input_output_aliases={0: 0},
    )(token_embedding, pe, bits)


# --------------------------------- demo ------------------------------------- #

if __name__ == "__main__":
    SEQ, BATCH, EMB = 8, 2, 32
    MAXLEN = 64
    DROPOUT_P = 0.1

    key = jax.random.PRNGKey(0)
    k_x, k_drop = jax.random.split(key)
    token_embedding = jax.random.normal(k_x, (SEQ, BATCH, EMB), dtype=jnp.float32)
    pos_embedding = make_pos_embedding(EMB, maxlen=MAXLEN)

    # Eval-mode forward (dropout = identity): must match reference exactly.
    out_eval = positional_encoding(
        token_embedding, pos_embedding, dropout_p=DROPOUT_P, training=False
    )
    out_eval = jax.block_until_ready(out_eval)
    ref = token_embedding + pos_embedding[:SEQ]
    assert out_eval.shape == (SEQ, BATCH, EMB)
    assert jnp.allclose(out_eval, ref, atol=1e-6, rtol=1e-6), "eval-mode mismatch"

    # Training-mode forward (inverted dropout, bits from jax.random).
    out_train = positional_encoding(
        token_embedding,
        pos_embedding,
        dropout_p=DROPOUT_P,
        training=True,
        rng_key=k_drop,
    )
    out_train = jax.block_until_ready(out_train)
    assert out_train.shape == (SEQ, BATCH, EMB)
    # Every element must be either dropped (0) or kept-and-rescaled.
    scale = 1.0 / (1.0 - DROPOUT_P)
    kept = jnp.isclose(out_train, ref * scale, atol=1e-5)
    dropped = jnp.isclose(out_train, 0.0, atol=1e-7)
    assert bool(jnp.all(kept | dropped)), "train-mode dropout semantics mismatch"

    print("KERNEL_OK")
</pallas_src>

<mosaic_0001>
module attributes {stable_mosaic.version = 11 : i64} {
  func.func @_pe_add_kernel(%arg0: i32, %arg1: memref<8x2x32xf32, #tpu.memory_space<vmem>>, %arg2: memref<8x1x32xf32, #tpu.memory_space<vmem>>, %arg3: memref<8x2x32xf32, #tpu.memory_space<vmem>>) attributes {dimension_semantics = [#tpu.dimension_semantics<parallel>], iteration_bounds = array<i64: 1>, scalar_prefetch = 0 : i64, scratch_operands = 0 : i64, tpu.core_type = #tpu.core_type<tc>, window_params = [{transform_indices = @transform_0, window_bounds = array<i64: 8, 2, 32>}, {transform_indices = @transform_1, window_bounds = array<i64: 8, 1, 32>}, {transform_indices = @transform_2, window_bounds = array<i64: 8, 2, 32>}]} {
    %c0 = arith.constant 0 : index
    %c0_0 = arith.constant 0 : index
    %c0_1 = arith.constant 0 : index
    %0 = vector.load %arg1[%c0, %c0_0, %c0_1] : memref<8x2x32xf32, #tpu.memory_space<vmem>>, vector<8x2x32xf32>
    %c0_2 = arith.constant 0 : index
    %c0_3 = arith.constant 0 : index
    %c0_4 = arith.constant 0 : index
    %1 = vector.load %arg2[%c0_2, %c0_3, %c0_4] : memref<8x1x32xf32, #tpu.memory_space<vmem>>, vector<8x1x32xf32>
    %2 = vector.broadcast %1 : vector<8x1x32xf32> to vector<8x2x32xf32>
    %3 = arith.addf %0, %2 : vector<8x2x32xf32>
    %c0_5 = arith.constant 0 : index
    %c0_6 = arith.constant 0 : index
    %c0_7 = arith.constant 0 : index
    %4 = vector.load %arg3[%c0_5, %c0_6, %c0_7] : memref<8x2x32xf32, #tpu.memory_space<vmem>>, vector<8x2x32xf32>
    tpu.vector_store %arg3[%c0_5, %c0_6, %c0_7], %3 {strides = array<i32>} : memref<8x2x32xf32, #tpu.memory_space<vmem>>, vector<8x2x32xf32>,
    return
  }
  func.func @transform_0(%arg0: i32) -> (i32, i32, i32) {
    %c0_i32 = arith.constant 0 : i32
    %c0_i32_0 = arith.constant 0 : i32
    %c0_i32_1 = arith.constant 0 : i32
    return %arg0, %c0_i32, %c0_i32_0 : i32, i32, i32
  }
  func.func @transform_1(%arg0: i32) -> (i32, i32, i32) {
    %c0_i32 = arith.constant 0 : i32
    %c0_i32_0 = arith.constant 0 : i32
    %c0_i32_1 = arith.constant 0 : i32
    return %arg0, %c0_i32, %c0_i32_0 : i32, i32, i32
  }
  func.func @transform_2(%arg0: i32) -> (i32, i32, i32) {
    %c0_i32 = arith.constant 0 : i32
    %c0_i32_0 = arith.constant 0 : i32
    %c0_i32_1 = arith.constant 0 : i32
    return %arg0, %c0_i32, %c0_i32_0 : i32, i32, i32
  }
}

</mosaic_0001>

<bundles_post_ra>
// kernel: tpu_custom_call.1
= control target key start
LH: loop header
LB: loop body
LE: loop exit
PB: predicated region body
PF: predicated region fallthrough
CT: control target
= control target key end

     0   :  { %7 = vsyncpa [#allocation3], 0  ;;  %s246_s0 = inlined_call_operand.hbm [shape: f32[8,2,32], index: 0, kind: input, shape index: {}, may-alias: {0,2}]   ;;  %s247_s1 = inlined_call_operand.vmem [shape: f32[8,1,32], index: 1, kind: input, shape index: {}]   ;;  %s248_s2 = inlined_call_operand.hbm [shape: f32[8,2,32], index: 2, kind: output, shape index: {}, may-alias: {0,2}]  }
   0x1   :  { %8 = vsyncpa [#allocation4], 0  ;;  %s180_s9 = smov [#allocation2]  }
   0x2   :  { %s14_s10 = sshll.u32 %s180_s9, 4  ;;  %s15_s10 = int_to_ptr.vmem [resolvable:$true] %s14_s10 }
   0x3   :  { %s144_s11 = scalar_lea.vmem %s15_s10, 256  ;;  %p149_p1 = scmp.lt.s32.totalorder %s15_s10, %s15_s10 }
   0x4   :  { %p145_p0 = scmp.ne.s32.totalorder %s15_s10, %s144_s11  ;;  %p150_p2 = scmp.lt.s32.totalorder %s144_s11, %s144_s11 }
   0x6   :  { %p151_p3 = por %p150_p2, %p149_p1 }
   0x8   :  { %p152_p4 = pnand %p151_p3, %p145_p0 }
   0xa   :  { %155 = shalt.err (!%p152_p4)
}
   0xb   :  { %s181_s12 = smov 32   ;;  %s182_s13 = smov 2  }
   0xc   :  { %20 = dma.hbm_to_vmem [thread:$0]  %s246_s0, 256, %s15_s10, [#allocation3], %s181_s12, %s181_s12, %s182_s13  }
   0xd   :  { %176 = dma.done.wait [#allocation3], 256  }
   0xe   :  { %177 = vsyncadd [#allocation3], 4294967040  ;;  %vm98_vm0 = vcmask 254976   ;;  %s183_s16 = smov [#allocation5]   ;;  %v26_v0 = vld [vmem:[#allocation2] sm:$0x3] }
   0xf   :  { %s205_s17 = sshll.u32 %s183_s16, 4  ;;  %v124_v1 = vld [vmem:[%s247_s1] ss:$0 sm:$0xff]  ;;  %v27_v2 = vld [vmem:[#allocation2 + $0x2] sm:$0x3]  ;;  %s113_s17 = int_to_ptr.vmem [resolvable:$true] %s205_s17 }
  0x10   :  { %v90_v3 = vadd.f32 %v124_v1, %v26_v0  ;;  %v125_v4 = vld [vmem:[%s247_s1 + $0x1] ss:$0 sm:$0xff]  ;;  %v28_v5 = vld [vmem:[#allocation2 + $0x4] sm:$0x3]  ;;  %v126_v6 = vld [vmem:[%s247_s1 + $0x2] ss:$0 sm:$0xff]  ;;  %p161_p6 = scmp.lt.s32.totalorder %s113_s17, %s113_s17 }
  0x11   :  { %v91_v7 = vadd.f32 %v125_v4, %v27_v2  ;;  %v92_v8 = vadd.f32 %v126_v6, %v28_v5  ;;  %v29_v9 = vld [vmem:[#allocation2 + $0x6] sm:$0x3]  ;;  %v127_v10 = vld [vmem:[%s247_s1 + $0x3] ss:$0 sm:$0xff]  ;;  %v30_v11 = vld [vmem:[#allocation2 + $0x8] sm:$0x3] }
  0x12   :  { %99 = vst.msk [vmem:[#allocation5] sm:$0x3] %vm98_vm0, %v90_v3  ;;  %v93_v12 = vadd.f32 %v127_v10, %v29_v9  ;;  %v128_v13 = vld [vmem:[%s247_s1 + $0x4] ss:$0 sm:$0xff]  ;;  %v31_v14 = vld [vmem:[#allocation2 + $0xa] sm:$0x3] }
  0x13   :  { %v129_v15 = vld [vmem:[%s247_s1 + $0x5] ss:$0 sm:$0xff]  ;;  %100 = vst.msk [vmem:[#allocation5 + $0x2] sm:$0x3] %vm98_vm0, %v91_v7  ;;  %101 = vst.msk [vmem:[#allocation5 + $0x4] sm:$0x3] %vm98_vm0, %v92_v8  ;;  %v94_v16 = vadd.f32 %v128_v13, %v30_v11 }
  0x14   :  { %v95_v17 = vadd.f32 %v129_v15, %v31_v14  ;;  %v32_v18 = vld [vmem:[#allocation2 + $0xc] sm:$0x3]  ;;  %v130_v19 = vld [vmem:[%s247_s1 + $0x6] ss:$0 sm:$0xff]  ;;  %v33_v20 = vld [vmem:[#allocation2 + $0xe] sm:$0x3] }
  0x15   :  { %102 = vst.msk [vmem:[#allocation5 + $0x6] sm:$0x3] %vm98_vm0, %v93_v12  ;;  %v96_v21 = vadd.f32 %v130_v19, %v32_v18  ;;  %v131_v22 = vld [vmem:[%s247_s1 + $0x7] ss:$0 sm:$0xff]  ;;  %103 = vst.msk [vmem:[#allocation5 + $0x8] sm:$0x3] %vm98_vm0, %v94_v16 }
  0x16   :  { %104 = vst.msk [vmem:[#allocation5 + $0xa] sm:$0x3] %vm98_vm0, %v95_v17  ;;  %v97_v23 = vadd.f32 %v131_v22, %v33_v20  ;;  %s156_s5 = scalar_lea.vmem %s113_s17, 256 }
  0x17   :  { %105 = vst.msk [vmem:[#allocation5 + $0xc] sm:$0x3] %vm98_vm0, %v96_v21  ;;  %p157_p5 = scmp.ne.s32.totalorder %s113_s17, %s156_s5  ;;  %p162_p7 = scmp.lt.s32.totalorder %s156_s5, %s156_s5 }
  0x18   :  { %106 = vst.msk [vmem:[#allocation5 + $0xe] sm:$0x3] %vm98_vm0, %v97_v23 }
  0x19   :  { %p163_p8 = por %p162_p7, %p161_p6 }
  0x1b   :  { %p164_p9 = pnand %p163_p8, %p157_p5 }
  0x1d   :  { %167 = shalt.err (!%p164_p9)
}
  0x1e   :  { %118 = dma.vmem_to_hbm [thread:$0]  %s113_s17, 256, %s248_s2, [#allocation4], %s181_s12, %s181_s12, %s182_s13  }
  0x1f   :  { %178 = dma.done.wait [#allocation4], 256  }
  0x20   :  { %179 = vsyncadd [#allocation4], 4294967040 }
  0x21   :  { %122 = vsyncpa [#allocation3], 1 }
  0x22   :  { %123 = vsyncpa [#allocation4], 1 }

</bundles_post_ra>
